<compile_context>
chip_gen: v6e
topology: v6e:2x2x1
jax: 0.10.0
libtpu: 0.0.40
codegen_flags: <defaults>
</compile_context>

<pallas_src>
import functools

import jax
import jax.numpy as jnp
from jax.experimental import pallas as pl
from jax.experimental.pallas import tpu as pltpu


def _fold_to_sublanes(x):
    """Column-sum a (rows, C) tile into an (8, C) partial using VPU adds.

    The cross-sublane (XLU) reduce is deferred to the JAX epilogue so per-tile
    work stays on the wider VALU slots.
    """
    rows, c = x.shape
    if rows >= 8 and rows % 8 == 0:
        # (rows, C) -> (rows//8, 8, C) is layout-preserving; axis-0 sum = vreg adds.
        return jnp.sum(x.reshape(rows // 8, 8, c), axis=0)
    # Small / ragged tile fallback: full reduce into sublane 0 of an (8, C) slab.
    s = jnp.sum(x, axis=0, keepdims=True)                      # (1, C)
    sub = jax.lax.broadcasted_iota(jnp.int32, (8, c), 0)
    return jnp.where(sub == 0, s, 0.0)


def _dice_partial_sums_kernel(logits_ref, target_ref, sp_ref, sy_ref, spy_ref,
                              *, n_rows, n_inner, alpha):
    """Accumulates S_p, S_y, S_py partials (shape (1, 8, C)) for one outer chunk."""
    tile_rows, c = logits_ref.shape
    o = pl.program_id(0)          # parallel chunk index
    i = pl.program_id(1)          # arbitrary (reduction) step within the chunk

    @pl.when(i == 0)
    def _init():
        sp_ref[...] = jnp.zeros_like(sp_ref)
        sy_ref[...] = jnp.zeros_like(sy_ref)
        spy_ref[...] = jnp.zeros_like(spy_ref)

    # Row-validity mask for the (possibly partial) last tile.
    row0 = (o * n_inner + i) * tile_rows
    local = jax.lax.broadcasted_iota(jnp.int32, (tile_rows, 1), 0)
    valid = (row0 + local) < n_rows                            # (tile_rows, 1) bool

    x = logits_ref[...].astype(jnp.float32)                    # (tile_rows, C)
    x = jnp.where(valid, x, 0.0)                               # keep padded rows finite

    # Softmax over the class axis (with_logits=True). Exact reciprocal keeps the
    # 1e-5 tolerance; it is one reciprocal per row, then N*C multiplies.
    m = jnp.max(x, axis=1, keepdims=True)
    e = jnp.exp(x - m)
    p = e * pl.reciprocal(jnp.sum(e, axis=1, keepdims=True), approx=False)

    # Focal-style reweighting (identity for alpha == 0, the default config).
    if alpha != 0.0:
        p = jnp.power(1.0 - p, alpha) * p

    validf = valid.astype(jnp.float32)
    p = p * validf                                             # zero padded rows

    # One-hot target via iota compare (index_label_position=True).
    cls = jax.lax.broadcasted_iota(jnp.int32, (tile_rows, c), 1)
    y = jnp.where((cls == target_ref[...]) & valid, 1.0, 0.0)  # (tile_rows, C)

    sp_ref[0] += _fold_to_sublanes(p)
    sy_ref[0] += _fold_to_sublanes(y)
    spy_ref[0] += _fold_to_sublanes(p * y)


def _choose_tile_rows(n, c, target_bytes=4 << 20):
    """~4 MiB f32 logits tiles: safe w/ double buffering on v5e/v6e/v7x."""
    rows = max(8, min(target_bytes // (4 * c), 1 << 17))
    rows = (rows // 8) * 8
    return n if n <= rows else rows


def dice_loss(logits, target, *, smooth=0.0001, alpha=0.0, tile_rows=None):
    """logits: (N, C) float, target: (N,) int. Returns scalar f32 loss."""
    n, c = logits.shape
    target2d = target.astype(jnp.int32).reshape(n, 1)

    if tile_rows is None:
        tile_rows = _choose_tile_rows(n, c)
    if tile_rows >= n:
        tile_rows = n
    else:
        tile_rows = max(8, (tile_rows // 8) * 8)

    total_tiles = pl.cdiv(n, tile_rows)
    # Outer 'parallel' split (feeds v7x's two TensorCores) when it divides evenly.
    n_outer = 2 if (total_tiles >= 2 and total_tiles % 2 == 0) else 1
    n_inner = total_tiles // n_outer

    kernel = functools.partial(_dice_partial_sums_kernel,
                               n_rows=n, n_inner=n_inner, alpha=alpha)

    in_block = lambda o, i: (o * n_inner + i, 0)
    out_block = lambda o, i: (o, 0, 0)
    part_shape = jax.ShapeDtypeStruct((n_outer, 8, c), jnp.float32)
    part_spec = pl.BlockSpec((1, 8, c), out_block)

    sp, sy, spy = pl.pallas_call(
        kernel,
        out_shape=(part_shape, part_shape, part_shape),
        grid_spec=pltpu.PrefetchScalarGridSpec(
            num_scalar_prefetch=0,
            grid=(n_outer, n_inner),
            in_specs=[
                pl.BlockSpec((tile_rows, c), in_block),
                pl.BlockSpec((tile_rows, 1), in_block),
            ],
            out_specs=[part_spec, part_spec, part_spec],
        ),
        compiler_params=pltpu.CompilerParams(
            dimension_semantics=("parallel", "arbitrary"),
            vmem_limit_bytes=32 * 1024 * 1024,
        ),
    )(logits, target2d)

    # Tiny O(C) epilogue: combine per-chunk / per-sublane partials and finalize.
    s_p = jnp.sum(sp, axis=(0, 1))                             # (C,)
    s_y = jnp.sum(sy, axis=(0, 1))
    s_py = jnp.sum(spy, axis=(0, 1))
    denom = s_p + s_y + smooth
    numer = 2.0 * s_py + n * smooth
    loss = c - jnp.sum(numer / denom) / n
    return loss.astype(jnp.float32)

    # TODO(synk): lane-dense relayout for very small C (samples on lanes) would
    # further cut VPU work; skipped to keep the in-kernel softmax reductions simple.


def dice_loss_ref(logits, target, *, smooth=0.0001, alpha=0.0):
    """Pure-JAX reference mirroring the PyTorch module (default config)."""
    n, c = logits.shape
    p = jax.nn.softmax(logits.astype(jnp.float32), axis=1)
    y = jax.nn.one_hot(target, c, dtype=jnp.float32)
    if alpha != 0.0:
        p = jnp.power(1.0 - p, alpha) * p
    denom = jnp.sum(p, axis=0) + jnp.sum(y, axis=0) + smooth        # (C,)
    loss_nc = 1.0 - (2.0 * p * y + smooth) / denom[None, :]         # (N, C)
    return jnp.mean(jnp.sum(loss_nc, axis=1))


if __name__ == "__main__":
    key = jax.random.PRNGKey(0)
    k1, k2, k3, k4, k5, k6 = jax.random.split(key, 6)

    # Test 1: small single-tile case (matches the module's typical usage).
    N, C = 16, 8
    logits = jax.random.normal(k1, (N, C), dtype=jnp.float32)
    target = jax.random.randint(k2, (N,), 0, C, dtype=jnp.int32)
    out = jax.block_until_ready(dice_loss(logits, target))
    ref = dice_loss_ref(logits, target)
    assert jnp.allclose(out, ref, rtol=1e-5, atol=1e-5), (out, ref)

    # Test 2: multi-tile grid, 2-way parallel outer split, masked partial last tile.
    N2, C2 = 250, 8
    logits2 = jax.random.normal(k3, (N2, C2), dtype=jnp.float32)
    target2 = jax.random.randint(k4, (N2,), 0, C2, dtype=jnp.int32)
    out2 = jax.block_until_ready(dice_loss(logits2, target2, tile_rows=32))
    ref2 = dice_loss_ref(logits2, target2)
    assert jnp.allclose(out2, ref2, rtol=1e-5, atol=1e-5), (out2, ref2)

    # Test 3: tiny ragged N (not a multiple of 8) exercises the fallback fold path.
    N3, C3 = 6, 5
    logits3 = jax.random.normal(k5, (N3, C3), dtype=jnp.float32)
    target3 = jax.random.randint(k6, (N3,), 0, C3, dtype=jnp.int32)
    out3 = jax.block_until_ready(dice_loss(logits3, target3))
    ref3 = dice_loss_ref(logits3, target3)
    assert jnp.allclose(out3, ref3, rtol=1e-5, atol=1e-5), (out3, ref3)

    # TODO(synk): OHEM branch (ohem_ratio > 0) uses data-dependent masked_select +
    # sort + thresholding; not implemented since the default config disables it.
    # TODO(synk): optional `mask` argument and the binary (_binary_class) path are
    # not implemented (default forward with logits_size > 1 and mask=None).
    print("KERNEL_OK")
</pallas_src>

<mosaic_0001>
module attributes {stable_mosaic.version = 11 : i64} {
  func.func @_dice_partial_sums_kernel(%arg0: i32, %arg1: i32, %arg2: memref<16x8xf32, #tpu.memory_space<vmem>>, %arg3: memref<16x1xi32, #tpu.memory_space<vmem>>, %arg4: memref<1x8x8xf32, #tpu.memory_space<vmem>>, %arg5: memref<1x8x8xf32, #tpu.memory_space<vmem>>, %arg6: memref<1x8x8xf32, #tpu.memory_space<vmem>>) attributes {dimension_semantics = [#tpu.dimension_semantics<parallel>, #tpu.dimension_semantics<arbitrary>], iteration_bounds = array<i64: 1, 1>, scalar_prefetch = 0 : i64, scratch_operands = 0 : i64, tpu.core_type = #tpu.core_type<tc>, window_params = [{transform_indices = @transform_0, window_bounds = array<i64: 16, 8>}, {transform_indices = @transform_1, window_bounds = array<i64: 16, 1>}, {transform_indices = @transform_2, window_bounds = array<i64: 1, 8, 8>}, {transform_indices = @transform_3, window_bounds = array<i64: 1, 8, 8>}, {transform_indices = @transform_4, window_bounds = array<i64: 1, 8, 8>}]} {
    %c0_i32 = arith.constant 0 : i32
    %0 = arith.cmpi eq, %arg1, %c0_i32 : i32
    %1 = arith.extui %0 : i1 to i32
    %c0_i32_0 = arith.constant 0 : i32
    %2 = arith.cmpi ne, %1, %c0_i32_0 : i32
    scf.if %2 {
      %cst_30 = arith.constant 0.000000e+00 : f32
      %64 = vector.broadcast %cst_30 : f32 to vector<1x8x8xf32>
      %c0_31 = arith.constant 0 : index
      %c0_32 = arith.constant 0 : index
      %c0_33 = arith.constant 0 : index
      %65 = vector.load %arg4[%c0_31, %c0_32, %c0_33] : memref<1x8x8xf32, #tpu.memory_space<vmem>>, vector<1x8x8xf32>
      tpu.vector_store %arg4[%c0_31, %c0_32, %c0_33], %64 {strides = array<i32>} : memref<1x8x8xf32, #tpu.memory_space<vmem>>, vector<1x8x8xf32>,
      %cst_34 = arith.constant 0.000000e+00 : f32
      %66 = vector.broadcast %cst_34 : f32 to vector<1x8x8xf32>
      %c0_35 = arith.constant 0 : index
      %c0_36 = arith.constant 0 : index
      %c0_37 = arith.constant 0 : index
      %67 = vector.load %arg5[%c0_35, %c0_36, %c0_37] : memref<1x8x8xf32, #tpu.memory_space<vmem>>, vector<1x8x8xf32>
      tpu.vector_store %arg5[%c0_35, %c0_36, %c0_37], %66 {strides = array<i32>} : memref<1x8x8xf32, #tpu.memory_space<vmem>>, vector<1x8x8xf32>,
      %cst_38 = arith.constant 0.000000e+00 : f32
      %68 = vector.broadcast %cst_38 : f32 to vector<1x8x8xf32>
      %c0_39 = arith.constant 0 : index
      %c0_40 = arith.constant 0 : index
      %c0_41 = arith.constant 0 : index
      %69 = vector.load %arg6[%c0_39, %c0_40, %c0_41] : memref<1x8x8xf32, #tpu.memory_space<vmem>>, vector<1x8x8xf32>
      tpu.vector_store %arg6[%c0_39, %c0_40, %c0_41], %68 {strides = array<i32>} : memref<1x8x8xf32, #tpu.memory_space<vmem>>, vector<1x8x8xf32>,
    } else {
    }
    %c1_i32 = arith.constant 1 : i32
    %3 = arith.muli %arg0, %c1_i32 : i32
    %4 = arith.addi %3, %arg1 : i32
    %c16_i32 = arith.constant 16 : i32
    %5 = arith.muli %4, %c16_i32 : i32
    %6 = tpu.iota {dimensions = array<i32: 0>} : vector<16x1xi32>
    %7 = vector.broadcast %5 : i32 to vector<16x1xi32>
    %8 = arith.addi %7, %6 : vector<16x1xi32>
    %c16_i32_1 = arith.constant 16 : i32
    %9 = vector.broadcast %c16_i32_1 : i32 to vector<16x1xi32>
    %10 = arith.cmpi slt, %8, %9 : vector<16x1xi32>
    %c0 = arith.constant 0 : index
    %c0_2 = arith.constant 0 : index
    %11 = vector.load %arg2[%c0, %c0_2] : memref<16x8xf32, #tpu.memory_space<vmem>>, vector<16x8xf32>
    %cst = arith.constant 0.000000e+00 : f32
    %12 = vector.shape_cast %10 : vector<16x1xi1> to vector<16x1xi1>
    %13 = vector.broadcast %12 : vector<16x1xi1> to vector<16x8xi1>
    %14 = vector.broadcast %cst : f32 to vector<16x8xf32>
    %15 = arith.select %13, %11, %14 : vector<16x8xi1>, vector<16x8xf32>
    %cst_3 = arith.constant dense<0xFF800000> : vector<16xf32>
    %16 = vector.multi_reduction <maximumf>, %15, %cst_3 [1] : vector<16x8xf32> to vector<16xf32>
    %17 = vector.shape_cast %16 : vector<16xf32> to vector<16x1xf32>
    %18 = vector.broadcast %17 : vector<16x1xf32> to vector<16x8xf32>
    %19 = arith.subf %15, %18 : vector<16x8xf32>
    %20 = math.exp %19 : vector<16x8xf32>
    %cst_4 = arith.constant dense<0.000000e+00> : vector<16xf32>
    %21 = vector.multi_reduction <add>, %20, %cst_4 [1] : vector<16x8xf32> to vector<16xf32>
    %22 = vector.shape_cast %21 : vector<16xf32> to vector<16x1xf32>
    %23 = tpu.reciprocal %22 : vector<16x1xf32> -> vector<16x1xf32>
    %24 = vector.broadcast %23 : vector<16x1xf32> to vector<16x8xf32>
    %25 = arith.mulf %20, %24 : vector<16x8xf32>
    %26 = arith.extui %10 : vector<16x1xi1> to vector<16x1xi32>
    %27 = arith.sitofp %26 : vector<16x1xi32> to vector<16x1xf32>
    %28 = vector.broadcast %27 : vector<16x1xf32> to vector<16x8xf32>
    %29 = arith.mulf %25, %28 : vector<16x8xf32>
    %30 = tpu.iota {dimensions = array<i32: 1>} : vector<16x8xi32>
    %c0_5 = arith.constant 0 : index
    %c0_6 = arith.constant 0 : index
    %31 = vector.load %arg3[%c0_5, %c0_6] : memref<16x1xi32, #tpu.memory_space<vmem>>, vector<16x1xi32>
    %32 = vector.broadcast %31 : vector<16x1xi32> to vector<16x8xi32>
    %33 = arith.cmpi eq, %30, %32 : vector<16x8xi32>
    %34 = vector.broadcast %10 : vector<16x1xi1> to vector<16x8xi1>
    %35 = arith.andi %33, %34 : vector<16x8xi1>
    %cst_7 = arith.constant 1.000000e+00 : f32
    %cst_8 = arith.constant 0.000000e+00 : f32
    %36 = vector.broadcast %cst_7 : f32 to vector<16x8xf32>
    %37 = vector.broadcast %cst_8 : f32 to vector<16x8xf32>
    %38 = arith.select %35, %36, %37 : vector<16x8xi1>, vector<16x8xf32>
    %c0_9 = arith.constant 0 : index
    %c0_10 = arith.constant 0 : index
    %c0_11 = arith.constant 0 : index
    %39 = vector.load %arg4[%c0_9, %c0_10, %c0_11] : memref<1x8x8xf32, #tpu.memory_space<vmem>>, vector<1x8x8xf32>
    %40 = vector.shape_cast %39 : vector<1x8x8xf32> to vector<8x8xf32>
    %41 = vector.shape_cast %29 : vector<16x8xf32> to vector<2x8x8xf32>
    %cst_12 = arith.constant dense<0.000000e+00> : vector<8x8xf32>
    %42 = vector.multi_reduction <add>, %41, %cst_12 [0] : vector<2x8x8xf32> to vector<8x8xf32>
    %43 = arith.addf %40, %42 : vector<8x8xf32>
    %c0_13 = arith.constant 0 : index
    %c0_14 = arith.constant 0 : index
    %c0_15 = arith.constant 0 : index
    %44 = vector.load %arg4[%c0_13, %c0_14, %c0_15] : memref<1x8x8xf32, #tpu.memory_space<vmem>>, vector<1x8x8xf32>
    %45 = vector.shape_cast %44 : vector<1x8x8xf32> to vector<8x8xf32>
    %46 = vector.shape_cast %43 : vector<8x8xf32> to vector<1x8x8xf32>
    tpu.vector_store %arg4[%c0_13, %c0_14, %c0_15], %46 {strides = array<i32>} : memref<1x8x8xf32, #tpu.memory_space<vmem>>, vector<1x8x8xf32>,
    %c0_16 = arith.constant 0 : index
    %c0_17 = arith.constant 0 : index
    %c0_18 = arith.constant 0 : index
    %47 = vector.load %arg5[%c0_16, %c0_17, %c0_18] : memref<1x8x8xf32, #tpu.memory_space<vmem>>, vector<1x8x8xf32>
    %48 = vector.shape_cast %47 : vector<1x8x8xf32> to vector<8x8xf32>
    %49 = vector.shape_cast %38 : vector<16x8xf32> to vector<2x8x8xf32>
    %cst_19 = arith.constant dense<0.000000e+00> : vector<8x8xf32>
    %50 = vector.multi_reduction <add>, %49, %cst_19 [0] : vector<2x8x8xf32> to vector<8x8xf32>
    %51 = arith.addf %48, %50 : vector<8x8xf32>
    %c0_20 = arith.constant 0 : index
    %c0_21 = arith.constant 0 : index
    %c0_22 = arith.constant 0 : index
    %52 = vector.load %arg5[%c0_20, %c0_21, %c0_22] : memref<1x8x8xf32, #tpu.memory_space<vmem>>, vector<1x8x8xf32>
    %53 = vector.shape_cast %52 : vector<1x8x8xf32> to vector<8x8xf32>
    %54 = vector.shape_cast %51 : vector<8x8xf32> to vector<1x8x8xf32>
    tpu.vector_store %arg5[%c0_20, %c0_21, %c0_22], %54 {strides = array<i32>} : memref<1x8x8xf32, #tpu.memory_space<vmem>>, vector<1x8x8xf32>,
    %c0_23 = arith.constant 0 : index
    %c0_24 = arith.constant 0 : index
    %c0_25 = arith.constant 0 : index
    %55 = vector.load %arg6[%c0_23, %c0_24, %c0_25] : memref<1x8x8xf32, #tpu.memory_space<vmem>>, vector<1x8x8xf32>
    %56 = vector.shape_cast %55 : vector<1x8x8xf32> to vector<8x8xf32>
    %57 = arith.mulf %29, %38 : vector<16x8xf32>
    %58 = vector.shape_cast %57 : vector<16x8xf32> to vector<2x8x8xf32>
    %cst_26 = arith.constant dense<0.000000e+00> : vector<8x8xf32>
    %59 = vector.multi_reduction <add>, %58, %cst_26 [0] : vector<2x8x8xf32> to vector<8x8xf32>
    %60 = arith.addf %56, %59 : vector<8x8xf32>
    %c0_27 = arith.constant 0 : index
    %c0_28 = arith.constant 0 : index
    %c0_29 = arith.constant 0 : index
    %61 = vector.load %arg6[%c0_27, %c0_28, %c0_29] : memref<1x8x8xf32, #tpu.memory_space<vmem>>, vector<1x8x8xf32>
    %62 = vector.shape_cast %61 : vector<1x8x8xf32> to vector<8x8xf32>
    %63 = vector.shape_cast %60 : vector<8x8xf32> to vector<1x8x8xf32>
    tpu.vector_store %arg6[%c0_27, %c0_28, %c0_29], %63 {strides = array<i32>} : memref<1x8x8xf32, #tpu.memory_space<vmem>>, vector<1x8x8xf32>,
    return
  }
  func.func @transform_0(%arg0: i32, %arg1: i32) -> (i32, i32) {
    %c1_i32 = arith.constant 1 : i32
    %0 = arith.muli %arg0, %c1_i32 : i32
    %1 = arith.addi %0, %arg1 : i32
    %c0_i32 = arith.constant 0 : i32
    %c0_i32_0 = arith.constant 0 : i32
    return %1, %c0_i32 : i32, i32
  }
  func.func @transform_1(%arg0: i32, %arg1: i32) -> (i32, i32) {
    %c1_i32 = arith.constant 1 : i32
    %0 = arith.muli %arg0, %c1_i32 : i32
    %1 = arith.addi %0, %arg1 : i32
    %c0_i32 = arith.constant 0 : i32
    %c0_i32_0 = arith.constant 0 : i32
    return %1, %c0_i32 : i32, i32
  }
  func.func @transform_2(%arg0: i32, %arg1: i32) -> (i32, i32, i32) {
    %c0_i32 = arith.constant 0 : i32
    %c0_i32_0 = arith.constant 0 : i32
    %c0_i32_1 = arith.constant 0 : i32
    return %arg0, %c0_i32, %c0_i32_0 : i32, i32, i32
  }
  func.func @transform_3(%arg0: i32, %arg1: i32) -> (i32, i32, i32) {
    %c0_i32 = arith.constant 0 : i32
    %c0_i32_0 = arith.constant 0 : i32
    %c0_i32_1 = arith.constant 0 : i32
    return %arg0, %c0_i32, %c0_i32_0 : i32, i32, i32
  }
  func.func @transform_4(%arg0: i32, %arg1: i32) -> (i32, i32, i32) {
    %c0_i32 = arith.constant 0 : i32
    %c0_i32_0 = arith.constant 0 : i32
    %c0_i32_1 = arith.constant 0 : i32
    return %arg0, %c0_i32, %c0_i32_0 : i32, i32, i32
  }
}

</mosaic_0001>

<bundles_post_ra>
// kernel: tpu_custom_call.1
= control target key start
LH: loop header
LB: loop body
LE: loop exit
PB: predicated region body
PF: predicated region fallthrough
CT: control target
= control target key end

     0   :  { %10 = vsyncpa [#allocation3], 0  ;;  %vm64_vm0 = vcmask 64512   ;;  %s348_s0 = inlined_call_operand.vmem [shape: f32[16,8], index: 0, kind: input, shape index: {}]   ;;  %s349_s1 = inlined_call_operand.vmem [shape: s32[16,1], index: 1, kind: input, shape index: {}]   ;;  %s350_s2 = inlined_call_operand.hbm [shape: f32[1,8,8], index: 2, kind: output, shape index: {0}]   ;;  %s351_s3 = inlined_call_operand.hbm [shape: f32[1,8,8], index: 3, kind: output, shape index: {1}]   ;;  %s352_s4 = inlined_call_operand.hbm [shape: f32[1,8,8], index: 4, kind: output, shape index: {2}]  }
   0x1   :  { %v78_v0 = vld [vmem:[%s348_s0] sm:$0xff]  ;;  %v79_v1 = vld [vmem:[%s348_s0 + $0x8] sm:$0xff] }
   0x2   :  { %11 = vsyncpa [#allocation5], 0  ;;  %v87_v2 = vsel %vm64_vm0, %v78_v0, -inf  ;;  %v90_v3 = vsel %vm64_vm0, %v79_v1, -inf  ;;  %v115_v4 = vld [vmem:[%s349_s1] sm:$0xff]  ;;  %v281_v5 = vmov 0   ;;  %v113_v18 = vlaneseq }
   0x3   :  { %88 = vmax.xlane.f32.xlu0 %v87_v2  ;;  %208 = vset.pattern.permute.xlu1 %v281_v5  ;;  %v282_v16 = vmov 0.0   ;;  %v116_v17 = vld [vmem:[%s349_s1 + $0x8] sm:$0xff]  ;;  %s283_s22 = smov [#allocation4]  }
   0x4   :  { %207 = vset.pattern.permute.xlu0 %v281_v5  ;;  %65 = vst.msk [vmem:[#allocation2] sm:$0xff] %vm64_vm0, %v282_v16  ;;  %66 = vst.msk [vmem:[#allocation4] sm:$0xff] %vm64_vm0, %v282_v16  ;;  %v114_v20 = vand.u32 127, %v113_v18  ;;  %s165_s1 = sshll.u32 %s283_s22, 4  ;;  %s166_s1 = int_to_ptr.vmem [resolvable:$true] %s165_s1 }
   0x5   :  { %67 = vst.msk [vmem:[#allocation6] sm:$0xff] %vm64_vm0, %v282_v16  ;;  %s217_s23 = scalar_lea.vmem %s166_s1, 128  ;;  %p222_p1 = scmp.lt.s32.totalorder %s166_s1, %s166_s1 }
   0x6   :  { %p218_p0 = scmp.ne.s32.totalorder %s166_s1, %s217_s23  ;;  %p223_p2 = scmp.lt.s32.totalorder %s217_s23, %s217_s23 }
   0x7   :  { %91 = vmax.xlane.f32.xlu0 %v90_v3 }
   0x8   :  { %p224_p3 = por %p223_p2, %p222_p1 }
   0xa   :  { %p225_p4 = pnand %p224_p3, %p218_p0 }
   0xb   :  { %v135_v27 = vld [vmem:[#allocation4] sm:$0xff] }
  0x1d   :  { %118 = vperm.xlu0 %207, %v115_v4  }
  0x8c   :  { %v89_v6 = vpop.xlane.xlu0 %88 }
  0x8d   :  { %v93_v7 = vsub.f32 %v78_v0, %v89_v6 }
  0x8f   :  { %v95_v8 = vmul.f32 1.442695, %v93_v7 }
  0x90   :  { %v92_v9 = vpop.xlane.xlu0 %91 }
  0x91   :  { %209 = vpow2.f32 %v95_v8  ;;  %v94_v10 = vsub.f32 %v79_v1, %v92_v9 }
  0x93   :  { %v97_v11 = vmul.f32 1.442695, %v94_v10 }
  0x95   :  { %211 = vpow2.f32 %v97_v11 }
  0x98   :  { %v119_v21 = vpop.permute.xlu0 %118 }
  0x99   :  { %vm123_vm1 = vcmp.eq.s32.totalorder %v114_v20, %v119_v21 }
  0x9a   :  { %v127_v23 = vsel %vm123_vm1, 1.0, %v282_v16 }
  0x9b   :  { %v136_v25 = vsel %vm64_vm0, %v127_v23, 0.0 }
  0x9e   :  { %v210_v12 = vpop.eup %209 }
  0x9f   :  { %v99_v13 = vsel %vm64_vm0, %v210_v12, 0.0 }
  0xa0   :  { %100 = vadd.xlane.f32.xlu1 %v99_v13 }
  0xa2   :  { %v212_v14 = vpop.eup %211 }
  0xa3   :  { %v102_v15 = vsel %vm64_vm0, %v212_v14, 0.0 }
  0xa4   :  { %103 = vadd.xlane.f32.xlu1 %v102_v15 }
  0xb5   :  { %121 = vperm.xlu1 %208, %v116_v17  }
 0x129   :  { %v101_v19 = vpop.xlane.xlu1 %100 }
 0x12a   :  { %213 = vrcp.f32 %v101_v19 }
 0x12d   :  { %v104_v22 = vpop.xlane.xlu1 %103 }
 0x12e   :  { %215 = vrcp.f32 %v104_v22 }
 0x131   :  { %v122_v24 = vpop.permute.xlu1 %121 }
 0x132   :  { %vm124_vm2 = vcmp.eq.s32.totalorder %v114_v20, %v122_v24 }
 0x133   :  { %v128_v26 = vsel %vm124_vm2, 1.0, %v282_v16 }
 0x134   :  { %v137_v28 = vsel %vm64_vm0, %v128_v26, 0.0 }
 0x135   :  { %v138_v29 = vadd.f32 %v137_v28, %v136_v25 }
 0x137   :  { %v214_v30 = vpop.eup %213  ;;  %v139_v31 = vadd.f32 %v138_v29, %v135_v27 }
 0x138   :  { %v107_v32 = vmul.f32 %v214_v30, %v210_v12 }
 0x139   :  { %140 = vst.msk [vmem:[#allocation4] sm:$0xff] %vm64_vm0, %v139_v31 }
 0x13a   :  { %228 = shalt.err (!%p225_p4)
}
 0x13b   :  { %168 = dma.vmem_to_hbm [thread:$0]  %s166_s1, 128, %s351_s3, [#allocation5]   ;;  %v216_v33 = vpop.eup %215  ;;  %v142_v34 = vmul.f32 %v127_v23, %v107_v32  ;;  %v130_v36 = vsel %vm64_vm0, %v107_v32, 0.0  ;;  %v129_v39 = vld [vmem:[#allocation2] sm:$0xff]  ;;  %v141_v43 = vld [vmem:[#allocation6] sm:$0xff] }
 0x13c   :  { %v108_v35 = vmul.f32 %v216_v33, %v212_v14  ;;  %s284_s26 = smov [#allocation2]   ;;  %s285_s28 = smov [#allocation6]  }
 0x13d   :  { %s155_s27 = sshll.u32 %s284_s26, 4  ;;  %v144_v41 = vsel %vm64_vm0, %v142_v34, 0.0  ;;  %s175_s29 = sshll.u32 %s285_s28, 4  ;;  %s156_s27 = int_to_ptr.vmem [resolvable:$true] %s155_s27  ;;  %s176_s29 = int_to_ptr.vmem [resolvable:$true] %s175_s29 }
 0x13e   :  { %v131_v37 = vsel %vm64_vm0, %v108_v35, 0.0  ;;  %v143_v38 = vmul.f32 %v128_v26, %v108_v35  ;;  %s237_s3 = scalar_lea.vmem %s156_s27, 128  ;;  %p242_p6 = scmp.lt.s32.totalorder %s156_s27, %s156_s27 }
 0x13f   :  { %v132_v40 = vadd.f32 %v131_v37, %v130_v36  ;;  %p238_p5 = scmp.ne.s32.totalorder %s156_s27, %s237_s3  ;;  %p243_p7 = scmp.lt.s32.totalorder %s237_s3, %s237_s3 }
 0x140   :  { %v145_v42 = vsel %vm64_vm0, %v143_v38, 0.0 }
 0x141   :  { %v146_v44 = vadd.f32 %v145_v42, %v144_v41  ;;  %v133_v45 = vadd.f32 %v132_v40, %v129_v39  ;;  %p244_p8 = por %p243_p7, %p242_p6 }
 0x143   :  { %134 = vst.msk [vmem:[#allocation2] sm:$0xff] %vm64_vm0, %v133_v45  ;;  %v147_v46 = vadd.f32 %v146_v44, %v141_v43  ;;  %p245_p9 = pnand %p244_p8, %p238_p5 }
 0x145   :  { %248 = shalt.err (!%p245_p9)
}
 0x146   :  { %158 = dma.vmem_to_hbm [thread:$0]  %s156_s27, 128, %s350_s2, [#allocation3]   ;;  %148 = vst.msk [vmem:[#allocation6] sm:$0xff] %vm64_vm0, %v147_v46 }
 0x147   :  { %s257_s6 = scalar_lea.vmem %s176_s29, 128  ;;  %p262_p11 = scmp.lt.s32.totalorder %s176_s29, %s176_s29 }
 0x148   :  { %p258_p10 = scmp.ne.s32.totalorder %s176_s29, %s257_s6  ;;  %p263_p12 = scmp.lt.s32.totalorder %s257_s6, %s257_s6 }
 0x14a   :  { %p264_p13 = por %p263_p12, %p262_p11 }
 0x14c   :  { %p265_p0 = pnand %p264_p13, %p258_p10 }
 0x14e   :  { %268 = shalt.err (!%p265_p0)
}
 0x14f   :  { %178 = dma.vmem_to_hbm [thread:$0]  %s176_s29, 128, %s352_s4, [#allocation5]  }
 0x150   :  { %277 = dma.done.wait [#allocation3], 128  }
 0x151   :  { %278 = vsyncadd [#allocation3], 4294967168 }
 0x152   :  { %279 = dma.done.wait [#allocation5], 256  }
 0x153   :  { %280 = vsyncadd [#allocation5], 4294967040 }
 0x154   :  { %188 = vsyncpa [#allocation3], 1 }
 0x155   :  { %189 = vsyncpa [#allocation5], 1 }

</bundles_post_ra>
